<compile_context>
chip_gen: v6e
topology: v6e:2x2x1
jax: 0.10.0
libtpu: 0.0.40
codegen_flags: <defaults>
</compile_context>

<pallas_src>
import functools

import numpy as np

import jax
import jax.numpy as jnp
from jax.experimental import pallas as pl
from jax.experimental.pallas import tpu as pltpu

_MiB = 1024 * 1024


def _landmark_fold_matrix():
    """Static [10, 8] matrix folding the landmark post-processing into w.

    lm columns 0..4 are x0..x4, 5..9 are y0..y4.  Output columns are
    interleaved (x0, y0, x1, y1, x2, y2, x_mouth, y_mouth) so the [N, 8]
    kernel output reshapes directly to [N, 4, 2] with no transpose.
    """
    m = np.zeros((10, 8), np.float32)
    for p in range(3):                 # eyes + nose, kept verbatim
        m[p, 2 * p] = 1.0              # x_p
        m[5 + p, 2 * p + 1] = 1.0      # y_p
    m[3, 6] = m[4, 6] = 0.5            # x_mouth = (x3 + x4) / 2
    m[8, 7] = m[9, 7] = 0.5            # y_mouth = (y3 + y4) / 2
    return jnp.asarray(m)


def _face_points_kernel(img_ref, w_ref, out_ref, *, n_k_blocks, resident_w):
    """img_ref: [TN, TK] f32, w_ref: [D, 8] or [TK, 8] f32, out_ref: [TN, 8]."""
    k = pl.program_id(2)

    @pl.when(k == 0)
    def _():
        out_ref[...] = jnp.zeros_like(out_ref)

    tk = img_ref.shape[1]
    if resident_w:
        # Full weight is VMEM-resident (fetched once); slice this k-tile's rows.
        col = pl.multiple_of((pl.program_id(0) * n_k_blocks + k) * tk, tk)
        w = w_ref[pl.ds(col, tk), :]
    else:
        w = w_ref[...]

    # f32 output block is resident across the (arbitrary) k axis -> accumulator.
    out_ref[...] += jnp.dot(img_ref[...], w, preferred_element_type=jnp.float32)


def _largest_divisor_tile(dim, target, align):
    """Largest multiple of `align` that divides `dim` and is <= target."""
    t = min(int(target), dim)
    t = (t // align) * align
    while t >= align:
        if dim % t == 0:
            return t
        t -= align
    return None


def _plan(N, D, itemsize):
    """Generation-aware tile plan: (tn, tk, split, resident_w, vmem_limit)."""
    try:
        vmem_cap = int(getattr(pltpu.get_tpu_info(), "vmem_capacity_bytes",
                               64 * _MiB))
    except Exception:  # conservative fallback (v7x-sized)
        vmem_cap = 64 * _MiB
    # v7x: 64 MiB physical VMEM per core; v5e/v6e: 128 MiB.  Leave headroom
    # for Mosaic internal scratch.
    vmem_limit = 48 * _MiB if vmem_cap <= 64 * _MiB else 64 * _MiB

    # Batch tile: at least two i-blocks when N allows (feeds both v7x TCs).
    if N >= 16:
        tn = _largest_divisor_tile(N, min(((N // 2) // 8) * 8, 2048), 8) or N
    else:
        tn = N
    n_i_blocks = N // tn

    # If the batch axis has a single block, split the reduction 2-way on a
    # leading parallel axis instead (partial sums summed in the wrapper).
    split = 2 if (n_i_blocks == 1 and D >= 256 and D % 256 == 0) else 1
    d_split = D // split

    # Weight stays fully VMEM-resident when small (fetched once, sliced inside).
    weight_bytes = D * 8 * itemsize
    resident_w = 2 * weight_bytes <= vmem_limit // 4

    # Reduction tile from the remaining VMEM byte budget (double-buffered).
    headroom = 4 * _MiB
    reserve = 2 * weight_bytes if resident_w else 0
    budget = max(vmem_limit - reserve - headroom, 2 * _MiB)
    row_bytes = (tn + (0 if resident_w else 8)) * itemsize
    tk_target = max(128, budget // (2 * row_bytes))
    tk = _largest_divisor_tile(d_split, tk_target, 128)
    if tk is None:
        # D has no suitable 128-multiple divisor: single full-D block.
        split, d_split = 1, D
        tk = _largest_divisor_tile(D, tk_target, 128) or D
        if 2 * tn * tk * itemsize > budget:
            # Full-D block too big for the budget: shrink the batch tile.
            fit = [d for d in range(8, N, 8)
                   if N % d == 0 and 2 * d * tk * itemsize <= budget]
            if fit:
                tn = max(fit)
    return tn, tk, split, resident_w, vmem_limit


def get_face_points(img, w_det):
    """img: [N, C, H, W] float32 (NCHW), w_det: [C*H*W, 10] float32.

    Returns landmark points of shape [N, 4, 2] (x, y per point), matching the
    reference module's output shape/axes (float32 instead of float64).
    """
    N, C, H, W = img.shape
    D = C * H * W
    itemsize = 4  # stream f32 directly; no wrapper-side cast

    # Fold the post-processing into the weights on the host.
    w_eff = (w_det @ _landmark_fold_matrix()).astype(jnp.float32)   # [D, 8]
    img_flat = img.reshape(N, D)                                    # [N, D] f32

    tn, tk, split, resident_w, vmem_limit = _plan(N, D, itemsize)
    n_k_blocks = (D // split) // tk
    grid = (split, N // tn, n_k_blocks)

    if resident_w:
        w_spec = pl.BlockSpec((D, 8), lambda s, i, k: (0, 0))
        w_read_bytes = D * 8 * itemsize
    else:
        w_spec = pl.BlockSpec(
            (tk, 8), lambda s, i, k, _kb=n_k_blocks: (s * _kb + k, 0))
        w_read_bytes = (N // tn) * D * 8 * itemsize

    kernel = functools.partial(
        _face_points_kernel, n_k_blocks=n_k_blocks, resident_w=resident_w)

    out = pl.pallas_call(
        kernel,
        out_shape=jax.ShapeDtypeStruct((split, N, 8), jnp.float32),
        grid_spec=pltpu.PrefetchScalarGridSpec(
            num_scalar_prefetch=0,
            grid=grid,
            in_specs=[
                # Image tile (tn, tk); column block offset by the D-split.
                pl.BlockSpec(
                    (tn, tk),
                    lambda s, i, k, _kb=n_k_blocks: (i, s * _kb + k)),
                w_spec,
            ],
            # Output block is the accumulator (resident across the k axis);
            # the leading split axis is squeezed out of the kernel ref.
            out_specs=pl.BlockSpec((pl.Squeezed(), tn, 8),
                                   lambda s, i, k: (s, i, 0)),
        ),
        compiler_params=pltpu.CompilerParams(
            dimension_semantics=("parallel", "parallel", "arbitrary"),
            vmem_limit_bytes=vmem_limit,
        ),
        cost_estimate=pl.CostEstimate(
            flops=2 * N * D * 8,
            transcendentals=0,
            bytes_accessed=(N * D * itemsize + w_read_bytes
                            + split * N * 8 * 4),
        ),
    )(img_flat, w_eff)

    # Sum the (1 or 2) partial-sum slabs; columns are already interleaved
    # (x, y) per point -> reshape only, no transpose.
    return out.sum(axis=0).reshape(N, 4, 2)


if __name__ == "__main__":
    key = jax.random.PRNGKey(0)
    k_img, k_w = jax.random.split(key)

    N, C, H, W = 2, 4, 16, 16
    img = jax.random.uniform(k_img, (N, C, H, W), dtype=jnp.float32)
    # Deterministic synthetic detector weights: [C*H*W, 10].
    w_det = (jax.random.normal(k_w, (C * H * W, 10), dtype=jnp.float32)
             / jnp.sqrt(jnp.float32(C * H * W)))

    points = get_face_points(img, w_det)
    jax.block_until_ready(points)
    assert points.shape == (N, 4, 2), points.shape

    # Reference: plain-JAX emulation of the PyTorch post-processing applied to
    # the synthetic landmark head.
    lm = img.reshape(N, -1) @ w_det                                   # [N, 10]
    pts = jnp.transpose(jnp.stack([lm[:, 0:5], lm[:, 5:10]], 1), (0, 2, 1))
    mouth = (pts[:, -1] + pts[:, -2]) / 2.0
    pts_ref = jnp.concatenate([pts[:, :-2], mouth[:, None, :]], axis=1)

    # 1) Weight-folded path must match the post-processing exactly.
    folded_ref = (img.reshape(N, -1)
                  @ (w_det @ _landmark_fold_matrix())).reshape(N, 4, 2)
    assert jnp.allclose(folded_ref, pts_ref, atol=1e-4, rtol=1e-4)

    # 2) Kernel (full f32 stream now) against the full-precision reference.
    assert jnp.allclose(points, pts_ref, atol=2e-3, rtol=2e-3), (
        float(jnp.max(jnp.abs(points - pts_ref))))

    print("KERNEL_OK")
</pallas_src>

<mosaic_0001>
module attributes {stable_mosaic.version = 11 : i64} {
  func.func @_face_points_kernel(%arg0: i32, %arg1: i32, %arg2: i32, %arg3: memref<2x512xf32, #tpu.memory_space<vmem>>, %arg4: memref<1024x8xf32, #tpu.memory_space<vmem>>, %arg5: memref<1x2x8xf32, #tpu.memory_space<vmem>>) attributes {dimension_semantics = [#tpu.dimension_semantics<parallel>, #tpu.dimension_semantics<parallel>, #tpu.dimension_semantics<arbitrary>], iteration_bounds = array<i64: 2, 1, 1>, scalar_prefetch = 0 : i64, scratch_operands = 0 : i64, tpu.core_type = #tpu.core_type<tc>, window_params = [{transform_indices = @transform_0, window_bounds = array<i64: 2, 512>}, {pipeline_mode = #tpu.pipeline_mode<synchronous>, transform_indices = @transform_1, window_bounds = array<i64: 1024, 8>}, {transform_indices = @transform_2, window_bounds = array<i64: 1, 2, 8>}]} {
    %c0_i32 = arith.constant 0 : i32
    %0 = arith.cmpi eq, %arg2, %c0_i32 : i32
    %1 = arith.extui %0 : i1 to i32
    %c0_i32_0 = arith.constant 0 : i32
    %2 = arith.cmpi ne, %1, %c0_i32_0 : i32
    scf.if %2 {
      %cst_9 = arith.constant 0.000000e+00 : f32
      %17 = vector.broadcast %cst_9 : f32 to vector<2x8xf32>
      %c0_10 = arith.constant 0 : index
      %c0_11 = arith.constant 0 : index
      %c0_12 = arith.constant 0 : index
      %18 = vector.load %arg5[%c0_10, %c0_11, %c0_12] : memref<1x2x8xf32, #tpu.memory_space<vmem>>, vector<1x2x8xf32>
      %19 = vector.shape_cast %18 : vector<1x2x8xf32> to vector<2x8xf32>
      %20 = vector.shape_cast %17 : vector<2x8xf32> to vector<1x2x8xf32>
      tpu.vector_store %arg5[%c0_10, %c0_11, %c0_12], %20 {strides = array<i32>} : memref<1x2x8xf32, #tpu.memory_space<vmem>>, vector<1x2x8xf32>,
    } else {
    }
    %c1_i32 = arith.constant 1 : i32
    %3 = arith.muli %arg0, %c1_i32 : i32
    %4 = arith.addi %3, %arg2 : i32
    %c512_i32 = arith.constant 512 : i32
    %5 = arith.muli %4, %c512_i32 : i32
    %6 = tpu.assume_multiple %5, 512 : i32
    %7 = arith.index_cast %6 : i32 to index
    %c0 = arith.constant 0 : index
    %8 = vector.load %arg4[%7, %c0] : memref<1024x8xf32, #tpu.memory_space<vmem>>, vector<512x8xf32>
    %c0_1 = arith.constant 0 : index
    %c0_2 = arith.constant 0 : index
    %c0_3 = arith.constant 0 : index
    %9 = vector.load %arg5[%c0_1, %c0_2, %c0_3] : memref<1x2x8xf32, #tpu.memory_space<vmem>>, vector<1x2x8xf32>
    %10 = vector.shape_cast %9 : vector<1x2x8xf32> to vector<2x8xf32>
    %c0_4 = arith.constant 0 : index
    %c0_5 = arith.constant 0 : index
    %11 = vector.load %arg3[%c0_4, %c0_5] : memref<2x512xf32, #tpu.memory_space<vmem>>, vector<2x512xf32>
    %cst = arith.constant dense<0.000000e+00> : vector<2x8xf32>
    %12 = tpu.matmul %11, %8, %cst {dimension_numbers = #tpu.dot_dimension_numbers<[1], [0], [0], [1], [0, 0, 1, 1], [], []>} : vector<2x512xf32>, vector<512x8xf32>, vector<2x8xf32> -> vector<2x8xf32>
    %13 = arith.addf %10, %12 : vector<2x8xf32>
    %c0_6 = arith.constant 0 : index
    %c0_7 = arith.constant 0 : index
    %c0_8 = arith.constant 0 : index
    %14 = vector.load %arg5[%c0_6, %c0_7, %c0_8] : memref<1x2x8xf32, #tpu.memory_space<vmem>>, vector<1x2x8xf32>
    %15 = vector.shape_cast %14 : vector<1x2x8xf32> to vector<2x8xf32>
    %16 = vector.shape_cast %13 : vector<2x8xf32> to vector<1x2x8xf32>
    tpu.vector_store %arg5[%c0_6, %c0_7, %c0_8], %16 {strides = array<i32>} : memref<1x2x8xf32, #tpu.memory_space<vmem>>, vector<1x2x8xf32>,
    return
  }
  func.func @transform_0(%arg0: i32, %arg1: i32, %arg2: i32) -> (i32, i32) {
    %c1_i32 = arith.constant 1 : i32
    %0 = arith.muli %arg0, %c1_i32 : i32
    %1 = arith.addi %0, %arg2 : i32
    %c0_i32 = arith.constant 0 : i32
    return %arg1, %1 : i32, i32
  }
  func.func @transform_1(%arg0: i32, %arg1: i32, %arg2: i32) -> (i32, i32) {
    %c0_i32 = arith.constant 0 : i32
    %c0_i32_0 = arith.constant 0 : i32
    %c0_i32_1 = arith.constant 0 : i32
    return %c0_i32, %c0_i32_0 : i32, i32
  }
  func.func @transform_2(%arg0: i32, %arg1: i32, %arg2: i32) -> (i32, i32, i32) {
    %c0_i32 = arith.constant 0 : i32
    %c0_i32_0 = arith.constant 0 : i32
    return %arg0, %arg1, %c0_i32 : i32, i32, i32
  }
}

</mosaic_0001>

<bundles_post_ra>
// kernel: tpu_custom_call.1
= control target key start
LH: loop header
LB: loop body
LE: loop exit
PB: predicated region body
PF: predicated region fallthrough
CT: control target
= control target key end

     0   :  { %7 = vsyncpa [#allocation3], 0  ;;  %s941_s0 = inlined_call_operand.vmem [shape: f32[2,1024], index: 0, kind: input, shape index: {}]   ;;  %s942_s1 = inlined_call_operand.vmem [shape: f32[1024,8], index: 1, kind: input, shape index: {}]   ;;  %s943_s2 = inlined_call_operand.hbm [shape: f32[2,2,8], index: 2, kind: output, shape index: {}]  }
   0x1   :  { %9 = vsyncpa [#allocation3 + $0x1], 0  ;;  %s758_s9 = smov 0   ;;  %s760_s10 = smov 0  }
   0x2   :  { %s762_s11 = smov 0   ;;  %s764_s12 = smov 0  }
   0x3   :  { %s766_s13 = smov 0   ;;  %s768_s14 = smov 0  }
   0x4 LB: > { %s521_s15 = sadd.s32 4294967295, %s738_s14   ;;  %s522_s16 = sadd.s32 4294967294, %s738_s14   ;;  %s738_s14 = sphi %s768_s14, %s15_s14   ;;  %s734_s13 = sphi %s766_s13, %s951_s13   ;;  %s730_s12 = sphi %s764_s12, %s950_s12   ;;  %s726_s11 = sphi %s762_s11, %s949_s11   ;;  %s722_s10 = sphi %s760_s10, %s948_s10   ;;  %s718_s9 = sphi %s758_s9, %s947_s9  }
   0x5   : > { %s34_s17 = sadd.s32 1, %s734_s13  ;;  %s94_s18 = sadd.s32 1, %s726_s11 }
   0x6   : > { %p36_p0 = scmp.ge.s32.totalorder %s34_s17, 2  ;;  %p104_p1 = scmp.ne.s32.totalorder %s726_s11, %s722_s10 }
   0x7   : > { %p105_p2 = scmp.eq.s32.totalorder %s521_s15, 1  ;;  %p110_p3 = scmp.ne.s32.totalorder %s722_s10, %s718_s9 }
   0x8   : > { %s953_s17 = smov (%p36_p0, %s34_s17), 0  ;;  %p111_p5 = scmp.eq.s32.totalorder %s522_s16, 1 }
   0x9   : > { %p798_p4 = por %p105_p2, %p104_p1  ;;  %s89_s20 = ssub.s32 %s734_s13, %s953_s17 }
   0xa   : > { %p525_p6 = scmp.ge.s32.totalorder %s738_s14, 1  ;;  %p92_p7 = scmp.eq.s32.totalorder %s89_s20, 0 }
   0xb   : > { %p805_p8 = por %p111_p5, %p110_p3  ;;  %p147_p9 = scmp.lt.s32.totalorder %s738_s14, 3 }
   0xc   : > { %s811_s22 = scalar_select %p92_p7, %s726_s11, %s94_s18  }
   0xd   : > { %p148_p10 = pnand %p525_p6, %p147_p9 }
   0xe   : > { %s529_s23 = sshll.u32 (!%p148_p10), %s730_s12, 9  ;;  %s527_s27 = sshll.u32 (!%p148_p10), %s730_s12, 2 }
   0xf   : > { %151 = sbr.rel (%p148_p10) target bundleno = 270 (0x10e), region = 28  ;;  %s817_s26 = scalar_lea.vmem (!%p148_p10), %s942_s1, %s529_s23 }
  0x10   : > { %p842_p11 = scmp.lt.s32.totalorder (!%p148_p10), %s527_s27, 7  ;;  %s171_s5 = sand.u32 (!%p148_p10), 1, %s722_s10  }
  0x11   : > { %s526_s6 = sshll.u32 (!%p148_p10), %s171_s5, 1  ;;  %s531_s8 = sshll.u32 (!%p148_p10), %s730_s12, 5 }
  0x12   : > { %s173_s7 = scalar_lea.vmem (!%p148_p10), [#allocation2], %s526_s6  ;;  %s439_s20 = scalar_lea.hbm (!%p148_p10), %s943_s2, %s531_s8 }
  0x13   : > { %s441_s15 = sshll.u32 (!%p148_p10), %s173_s7, 4  ;;  %s427_s23 = scalar_lea.sflag (!%p148_p10), [#allocation3], %s171_s5  ;;  %s442_s15 = int_to_ptr.vmem [resolvable:$true] %s441_s15 }
  0x14   : > { %v226_v0 = vld [vmem:[%s817_s26 + $0xf8] sm:$0xff]  ;;  %v225_v4 = vld [vmem:[%s817_s26 + $0xf0] sm:$0xff]  ;;  %v224_v8 = vld [vmem:[%s817_s26 + $0xe8] sm:$0xff]  ;;  %s955_s27 = smov (!%p842_p11, %s527_s27), 7  ;;  %v740_v30 = vmov 1983009808   ;;  %v266_v32 = vlaneseq }
  0x15   : > { %v258_v1 = vld [vmem:[%s817_s26 + $0x1f8] sm:$0xff]  ;;  %534 = vmatprep.subr.mxu0 %v226_v0  ;;  %v257_v5 = vld [vmem:[%s817_s26 + $0x1f0] sm:$0xff]  ;;  %v256_v9 = vld [vmem:[%s817_s26 + $0x1e8] sm:$0xff]  ;;  %v264_v31 = vunpack.c.l.s4 %v740_v30  ;;  %s528_s29 = sshll.u32 %s955_s27, 1  ;;  %vm190_vm0 = vcmask 58368   ;;  %s662_s24 = scalar_lea.vmem %s442_s15, 32 }
  0x16   : > { %v210_v2 = vld [vmem:[%s817_s26 + $0x78] sm:$0xff]  ;;  %569 = vmatprep.subr.mxu1 %v258_v1  ;;  %v209_v6 = vld [vmem:[%s817_s26 + $0x70] sm:$0xff]  ;;  %v208_v10 = vld [vmem:[%s817_s26 + $0x68] sm:$0xff]  ;;  %v267_v42 = vshrl.u32 %v266_v32, 7  ;;  %s183_s4 = scalar_lea.vmem %s941_s0, %s528_s29  ;;  %p663_p12 = scmp.ne.s32.totalorder %s442_s15, %s662_s24 }
  0x17   : > { %v242_v3 = vld [vmem:[%s817_s26 + $0x178] sm:$0xff]  ;;  %535 = vmatpush3.msra.mxu0 %v210_v2  ;;  %v241_v7 = vld [vmem:[%s817_s26 + $0x170] sm:$0xff]  ;;  %v240_v11 = vld [vmem:[%s817_s26 + $0x168] sm:$0xff]  ;;  %v265_v41 = vunpack.c.0.s8 %v264_v31  ;;  %s742_s25 = smov [#allocation2]  }
  0x18   : > { %570 = vmatpush3.msra.mxu1 %v242_v3  ;;  %536 = vmatprep.subr.mxu0 %v225_v4  ;;  %v223_v12 = vld [vmem:[%s817_s26 + $0xe0] sm:$0xff]  ;;  %v222_v16 = vld [vmem:[%s817_s26 + $0xd8] sm:$0xff]  ;;  %v221_v20 = vld [vmem:[%s817_s26 + $0xd0] sm:$0xff]  ;;  %p664_p13 = pnand %p663_p12, %p798_p4 }
  0x19   : > { %571 = vmatprep.subr.mxu1 %v257_v5  ;;  %537 = vmatpush3.msra.mxu0 %v209_v6  ;;  %v255_v13 = vld [vmem:[%s817_s26 + $0x1e0] sm:$0xff]  ;;  %v254_v17 = vld [vmem:[%s817_s26 + $0x1d8] sm:$0xff]  ;;  %v253_v21 = vld [vmem:[%s817_s26 + $0x1d0] sm:$0xff]  ;;  %v268_v51 = vsub.s32 %v265_v41, %v267_v42 }
  0x1a   : > { %572 = vmatpush3.msra.mxu1 %v241_v7  ;;  %538 = vmatprep.subr.mxu0 %v224_v8  ;;  %v207_v14 = vld [vmem:[%s817_s26 + $0x60] sm:$0xff]  ;;  %v206_v18 = vld [vmem:[%s817_s26 + $0x58] sm:$0xff]  ;;  %v205_v22 = vld [vmem:[%s817_s26 + $0x50] sm:$0xff]  ;;  %p665_p0 = pneg %p664_p13 }
  0x1b   : > { %573 = vmatprep.subr.mxu1 %v256_v9  ;;  %v239_v15 = vld [vmem:[%s817_s26 + $0x160] sm:$0xff]  ;;  %539 = vmatpush3.msra.mxu0 %v208_v10  ;;  %v238_v19 = vld [vmem:[%s817_s26 + $0x158] sm:$0xff]  ;;  %v237_v23 = vld [vmem:[%s817_s26 + $0x150] sm:$0xff] }
  0x1c   : > { %574 = vmatpush3.msra.mxu1 %v240_v11  ;;  %540 = vmatprep.subr.mxu0 %v223_v12  ;;  %v220_v24 = vld [vmem:[%s817_s26 + $0xc8] sm:$0xff]  ;;  %v219_v28 = vld [vmem:[%s817_s26 + $0xc0] sm:$0xff]  ;;  %v218_v35 = vld [vmem:[%s817_s26 + $0xb8] sm:$0xff]  ;;  %v741_v12 = vmov 0.0  }
  0x1d   : > { %575 = vmatprep.subr.mxu1 %v255_v13  ;;  %541 = vmatpush3.msra.mxu0 %v207_v14  ;;  %v252_v25 = vld [vmem:[%s817_s26 + $0x1c8] sm:$0xff]  ;;  %v251_v29 = vld [vmem:[%s817_s26 + $0x1c0] sm:$0xff]  ;;  %v250_v36 = vld [vmem:[%s817_s26 + $0x1b8] sm:$0xff]  ;;  %191 = vst.msk [vmem:[%s173_s7] sm:$0x3] %vm190_vm0, %v741_v12 }
  0x1e   : > { %576 = vmatpush3.msra.mxu1 %v239_v15  ;;  %542 = vmatprep.subr.mxu0 %v222_v16  ;;  %v204_v26 = vld [vmem:[%s817_s26 + $0x48] sm:$0xff]  ;;  %v203_v33 = vld [vmem:[%s817_s26 + $0x40] sm:$0xff]  ;;  %v202_v37 = vld [vmem:[%s817_s26 + $0x38] sm:$0xff] }
  0x1f   : > { %577 = vmatprep.subr.mxu1 %v254_v17  ;;  %543 = vmatpush3.msra.mxu0 %v206_v18  ;;  %v236_v27 = vld [vmem:[%s817_s26 + $0x148] sm:$0xff]  ;;  %v235_v34 = vld [vmem:[%s817_s26 + $0x140] sm:$0xff]  ;;  %v234_v38 = vld [vmem:[%s817_s26 + $0x138] sm:$0xff] }
  0x20   : > { %578 = vmatpush3.msra.mxu1 %v238_v19  ;;  %544 = vmatprep.subr.mxu0 %v221_v20  ;;  %v217_v39 = vld [vmem:[%s817_s26 + $0xb0] sm:$0xff]  ;;  %v216_v45 = vld [vmem:[%s817_s26 + $0xa8] sm:$0xff]  ;;  %v215_v49 = vld [vmem:[%s817_s26 + $0xa0] sm:$0xff] }
  0x21   : > { %579 = vmatprep.subr.mxu1 %v253_v21  ;;  %545 = vmatpush3.msra.mxu0 %v205_v22  ;;  %v249_v40 = vld [vmem:[%s817_s26 + $0x1b0] sm:$0xff]  ;;  %v248_v46 = vld [vmem:[%s817_s26 + $0x1a8] sm:$0xff]  ;;  %v247_v50 = vld [vmem:[%s817_s26 + $0x1a0] sm:$0xff] }
  0x22   : > { %580 = vmatpush3.msra.mxu1 %v237_v23  ;;  %546 = vmatprep.subr.mxu0 %v220_v24  ;;  %v201_v43 = vld [vmem:[%s817_s26 + $0x30] sm:$0xff]  ;;  %v200_v47 = vld [vmem:[%s817_s26 + $0x28] sm:$0xff]  ;;  %v199_v52 = vld [vmem:[%s817_s26 + $0x20] sm:$0xff] }
  0x23   : > { %581 = vmatprep.subr.mxu1 %v252_v25  ;;  %547 = vmatpush3.msra.mxu0 %v204_v26  ;;  %v233_v44 = vld [vmem:[%s817_s26 + $0x130] sm:$0xff]  ;;  %v232_v48 = vld [vmem:[%s817_s26 + $0x128] sm:$0xff]  ;;  %v231_v53 = vld [vmem:[%s817_s26 + $0x120] sm:$0xff] }
  0x24   : > { %582 = vmatpush3.msra.mxu1 %v236_v27  ;;  %548 = vmatprep.subr.mxu0 %v219_v28  ;;  %v260_v54 = vld [vmem:[%s183_s4] sm:$0xff]  ;;  %v214_v55 = vld [vmem:[%s817_s26 + $0x98] sm:$0xff]  ;;  %v213_v60 = vld [vmem:[%s817_s26 + $0x90] sm:$0xff] }
  0x25   : > { %583 = vmatprep.subr.mxu1 %v251_v29  ;;  %549 = vmatpush3.msra.mxu0 %v203_v33  ;;  %v246_v56 = vld [vmem:[%s817_s26 + $0x198] sm:$0xff]  ;;  %v262_v57 = vcombine.high %v260_v54, %v260_v54  ;;  %v245_v61 = vld [vmem:[%s817_s26 + $0x190] sm:$0xff]  ;;  %v269_v62 = vrot.slane %v260_v54, %v268_v51  ;;  %v212_v2 = vld [vmem:[%s817_s26 + $0x88] sm:$0xff] }
  0x26   : > { %584 = vmatpush3.msra.mxu1 %v235_v34  ;;  %550 = vmatprep.subr.mxu0 %v218_v35  ;;  %v198_v58 = vld [vmem:[%s817_s26 + $0x18] sm:$0xff]  ;;  %v197_v63 = vld [vmem:[%s817_s26 + $0x10] sm:$0xff]  ;;  %v244_v3 = vld [vmem:[%s817_s26 + $0x188] sm:$0xff] }
  0x27   : > { %585 = vmatprep.subr.mxu1 %v250_v36  ;;  %551 = vmatpush3.msra.mxu0 %v202_v37  ;;  %v230_v59 = vld [vmem:[%s817_s26 + $0x118] sm:$0xff]  ;;  %v229_v0 = vld [vmem:[%s817_s26 + $0x110] sm:$0xff]  ;;  %v276_v1 = vrot.slane %v262_v57, %v268_v51  ;;  %v196_v4 = vld [vmem:[%s817_s26 + $0x8] sm:$0xff]  ;;  %v277_v8 = vcombine.high %v269_v62, %v269_v62 }
  0x28   : > { %586 = vmatpush3.msra.mxu1 %v234_v38  ;;  %552 = vmatprep.subr.mxu0 %v217_v39  ;;  %v228_v5 = vld [vmem:[%s817_s26 + $0x108] sm:$0xff]  ;;  %v211_v6 = vld [vmem:[%s817_s26 + $0x80] sm:$0xff] }
  0x29   : > { %587 = vmatprep.subr.mxu1 %v249_v40  ;;  %553 = vmatpush3.msra.mxu0 %v201_v43  ;;  %v243_v7 = vld [vmem:[%s817_s26 + $0x180] sm:$0xff]  ;;  %v278_v10 = vcombine.high %v276_v1, %v276_v1 }
  0x2a   : > { %588 = vmatpush3.msra.mxu1 %v233_v44  ;;  %554 = vmatprep.subr.mxu0 %v216_v45  ;;  %v195_v9 = vld [vmem:[%s817_s26] sm:$0xff] }
  0x2b   : > { %589 = vmatprep.subr.mxu1 %v248_v46  ;;  %555 = vmatpush3.msra.mxu0 %v200_v47  ;;  %v227_v11 = vld [vmem:[%s817_s26 + $0x100] sm:$0xff]  ;;  %s666_s26 = sshll.u32 %s742_s25, 4  ;;  %s667_s26 = int_to_ptr.vmem [resolvable:$false] %s666_s26 }
  0x2c   : > { %590 = vmatpush3.msra.mxu1 %v232_v48  ;;  %556 = vmatprep.subr.mxu0 %v215_v49  ;;  %v259_v19 = vld [vmem:[%s173_s7] sm:$0x3]  ;;  %s668_s12 = scalar_lea.vmem %s667_s26, 64  ;;  %p669_p1 = scmp.lt.s32.totalorder %s442_s15, %s667_s26 }
  0x2d   : > { %591 = vmatprep.subr.mxu1 %v247_v50  ;;  %557 = vmatpush3.msra.mxu0 %v199_v52  ;;  %p670_p2 = scmp.lt.s32.totalorder %s668_s12, %s662_s24 }
  0x2e   : > { %592 = vmatpush3.msra.mxu1 %v231_v53  ;;  %558 = vmatprep.subr.mxu0 %v214_v55 }
  0x2f   : > { %593 = vmatprep.subr.mxu1 %v246_v56  ;;  %559 = vmatpush3.msra.mxu0 %v198_v58  ;;  %p671_p3 = por %p670_p2, %p669_p1 }
  0x30   : > { %594 = vmatpush3.msra.mxu1 %v230_v59  ;;  %560 = vmatprep.subr.mxu0 %v213_v60 }
  0x31   : > { %595 = vmatprep.subr.mxu1 %v245_v61  ;;  %561 = vmatpush3.msra.mxu0 %v197_v63  ;;  %p672_p5 = pnand %p671_p3, %p665_p0 }
  0x32   : > { %596 = vmatpush3.msra.mxu1 %v229_v0  ;;  %562 = vmatprep.subr.mxu0 %v212_v2 }
  0x33   : > { %597 = vmatprep.subr.mxu1 %v244_v3  ;;  %563 = vmatpush3.msra.mxu0 %v196_v4 }
  0x34   : > { %598 = vmatpush3.msra.mxu1 %v228_v5  ;;  %564 = vmatprep.subr.mxu0 %v211_v6 }
  0x35   : > { %599 = vmatprep.subr.mxu1 %v243_v7  ;;  %565 = vmatpush3.msra.mxu0 %v195_v9 }
  0x36   : > { %347 = vmatprep.mubr.f32.mxu0 %v277_v8  ;;  %600 = vmatpush3.msra.mxu1 %v227_v11 }
  0x37   : > { %417 = vmatprep.mubr.f32.mxu1 %v278_v10  ;;  %348 = vmatmul.mubr.f32.vlgmr.msra.gmra.mxu0 %v269_v62 }
  0x38   : > { %418 = vmatmul.mubr.f32.vlgmr.msra.gmra.mxu1 %v276_v1 }
  0xf7   : > { %v566_v13 = vpop.f32.mrf.mxu0 }
  0xf8   : > { %v601_v14 = vpop.f32.mrf.mxu1 }
  0xf9   : > { %v567_v15 = vpop.f32.mrf.mxu0 }
  0xfa   : > { %v602_v16 = vpop.f32.mrf.mxu1  ;;  %v568_v17 = vadd.f32 %v567_v15, %v566_v13 }
  0xfb   : > { %v603_v18 = vadd.f32 %v602_v16, %v601_v14 }
  0xfd   : > { %v420_v20 = vadd.f32 %v603_v18, %v568_v17 }
  0xff   : > { %v423_v21 = vadd.f32 %v420_v20, %v259_v19 }
 0x101   : > { %425 = vst.msk [vmem:[%s173_s7] sm:$0x3] %vm190_vm0, %v423_v21 }
 0x102   : > { %675 = shalt.err (!%p672_p5)
}
 0x103   : > { %s676_s27 = scalar_lea.hbm %s439_s20, 32  ;;  %s680_s30 = scalar_lea.hbm %s943_s2, 64 }
 0x104   : > { %p677_p6 = scmp.ne.s32.totalorder %s439_s20, %s676_s27  ;;  %p681_p10 = scmp.lt.s32.totalorder %s439_s20, %s943_s2 }
 0x105   : > { %p682_p11 = scmp.lt.s32.totalorder %s680_s30, %s676_s27 }
 0x106   : > { %p678_p7 = pnand %p677_p6, %p798_p4 }
 0x107   : > { %p683_p12 = por %p682_p11, %p681_p10 }
 0x108   : > { %p679_p9 = pneg %p678_p7 }
 0x10a   : > { %p684_p13 = pnand %p683_p12, %p679_p9 }
 0x10c   : > { %687 = shalt.err (!%p684_p13)
}
 0x10d   : > { %604 = dma.vmem_to_hbm [thread:$0]  (%p798_p4), %s442_s15, 32, %s439_s20, %s427_s23  }
 0x10e PF: > { %p610_p0 = scmp.ge.s32.totalorder %s738_s14, 2  ;;  %s453_s5 = sand.u32 1, %s718_s9  }
 0x10f   : > { %s454_s6 = scalar_lea.sflag [#allocation3], %s453_s5 }
 0x110   : > { %p607_p1 = pnand %p610_p0, %p805_p8 }
 0x112   : > { %p608_p2 = pneg %p607_p1 }
 0x114   : > { %713 = dma.done.wait (%p608_p2), %s454_s6, 32  }
 0x115   : > { %715 = vsyncadd (%p608_p2), %s454_s6, 4294967264  ;;  %s15_s14 = sadd.s32 1, %s738_s14   ;;  %s947_s9 = smov %s722_s10 }
 0x116   : > { %p12_p3 = scmp.ge.s32.totalorder %s15_s14, 4   ;;  %s948_s10 = smov %s726_s11 }
 0x117   : > { %s949_s11 = smov %s811_s22  ;;  %s950_s12 = smov %s734_s13 }
 0x118   : > { %s951_s13 = smov %s953_s17  ;;  %14 = sbr.rel (!%p12_p3) target bundleno = 4 (0x4), region = 68 }
 0x11d   :  { %459 = vsyncpa [#allocation3], 1 }
 0x11e   :  { %461 = vsyncpa [#allocation3 + $0x1], 1 }

</bundles_post_ra>
